<compile_context>
chip_gen: v7x
topology: tpu7x:2x2x1
jax: 0.10.0
libtpu: 0.0.40
codegen_flags: <defaults>
</compile_context>

<pallas_src>
import jax
import jax.numpy as jnp
from jax import lax
from jax.experimental import pallas as pl
from jax.experimental.pallas import tpu as pltpu


# ---------------------------------------------------------------------------
# Pallas kernel: runs ALL reversible coupling layers for one row-tile.
# ---------------------------------------------------------------------------
def rev_mlp_kernel(x_ref, w_ref, o_ref):
    # x_ref : (tile_r, F)  VMEM   (F = 2*d; both halves in one lane-dense block)
    # w_ref : (L, d, d)    VMEM   (pre-transposed to (in, out); constant block index)
    # o_ref : (tile_r, F)  VMEM
    num_layers, d, _ = w_ref.shape
    mm_dtype = w_ref.dtype

    x = x_ref[...]
    x1 = x[:, :d].astype(jnp.float32)   # running streams kept in f32
    x2 = x[:, d:].astype(jnp.float32)

    def couple(x1, x2, w):
        # MXU matmul with f32 accumulation; coupling add stays f32.
        h = jnp.dot(x2.astype(mm_dtype), w, preferred_element_type=jnp.float32)
        return x2, x1 + h

    if num_layers <= 8:
        # Small static L -> unrolled python loop (full LLO scheduler visibility).
        for l in range(num_layers):
            x1, x2 = couple(x1, x2, w_ref[l])
    else:
        # Large L -> fori_loop bounds live ranges (avoids spills at big row tiles).
        def body(l, carry):
            a, b = carry
            return couple(a, b, w_ref[l])
        x1, x2 = lax.fori_loop(0, num_layers, body, (x1, x2))

    # Two direct half-stores; d % 128 == 0 keeps both lane-aligned, unmasked vst.
    o_ref[:, :d] = x1.astype(o_ref.dtype)
    o_ref[:, d:] = x2.astype(o_ref.dtype)


# ---------------------------------------------------------------------------
# Helpers
# ---------------------------------------------------------------------------
def _round_up(a, b):
    return ((a + b - 1) // b) * b


def _tpu_vmem_capacity_bytes():
    """Physical VMEM per TensorCore: 128 MiB on v5e/v6e, 64 MiB on v7x."""
    try:
        info = pltpu.get_tpu_info()
        for attr in ("vmem_capacity_bytes", "vmem_size_bytes", "vmem_bytes"):
            cap = getattr(info, attr, None)
            if cap:
                return int(cap)
    except Exception:
        pass
    try:
        kind = jax.devices()[0].device_kind.lower()
        if "v5" in kind or "v6" in kind:
            return 128 << 20
    except Exception:
        pass
    return 64 << 20   # conservative default (v7x-sized)


def prepare_reversible_mlp_weights(weights, compute_dtype=None):
    """Hoisted param-prep (call once, not per forward).

    weights: (L, d, d) in nn.Linear (out, in) layout.
    Returns (L, d, d) in (in, out) layout so the kernel does x2 @ W with no
    in-kernel transpose. Optionally cast to compute_dtype (e.g. bfloat16).

    NOTE: the lane-dense fast path assumes d % 128 == 0; other d remain correct
    but incur masked/relayout traffic per layer.
    TODO(synk): optionally zero-pad d to a multiple of 128 here for odd sizes.
    """
    w_t = jnp.swapaxes(weights, 1, 2)
    if compute_dtype is not None:
        w_t = w_t.astype(compute_dtype)
    return w_t


# ---------------------------------------------------------------------------
# Wrapper
# ---------------------------------------------------------------------------
def reversible_mlp_forward(x, w_prepared, *, tile_r=1024):
    """x: (B, C, F); w_prepared: (L, F//2, F//2) from prepare_reversible_mlp_weights.

    Returns (B, C, F) in x.dtype.
    """
    B, C, F = x.shape
    assert F % 2 == 0, "feature_dim must be even (split into two halves)"
    d = F // 2
    L = w_prepared.shape[0]
    assert w_prepared.shape == (L, d, d)
    rows = B * C
    x2d = x.reshape(rows, F)

    a_item = jnp.dtype(x.dtype).itemsize
    w_item = jnp.dtype(w_prepared.dtype).itemsize
    w_bytes = L * d * d * w_item

    # Single-buffer the invariant weight slab only when it is big enough to matter
    # (default double-buffered path kept for tiny slabs).
    single_buffer_weights = w_bytes > (4 << 20)
    w_resident = w_bytes if single_buffer_weights else 2 * w_bytes

    # --- VMEM budgeting (per generation) ----------------------------------
    vmem_cap = _tpu_vmem_capacity_bytes()
    budget = int(0.70 * vmem_cap)

    row_align = 16 if a_item < 4 else 8
    tile_r = min(int(tile_r), _round_up(rows, row_align))
    tile_r = max(row_align, (tile_r // row_align) * row_align)

    def act_bytes(tr):
        # double-buffered in/out activation tiles + in-kernel f32 x1/x2/h live values
        return 2 * 2 * tr * F * a_item + 4 * tr * F * 4

    while tile_r > row_align and w_resident + act_bytes(tile_r) > budget:
        tile_r = max(row_align, ((tile_r // 2) // row_align) * row_align)
    # TODO(synk): if w_resident alone exceeds the budget (huge L*d*d on v7x), add a
    # layer-streaming path: grid=(row_tiles, L) with a (1, d, d) weight block and
    # x1/x2 carried in VMEM scratch.

    grid = (pl.cdiv(rows, tile_r),)   # ragged last tile handled by Pallas (masked stores)

    vmem_est = w_resident + act_bytes(tile_r) + (4 << 20)
    vmem_limit = int(min(max(vmem_est, 32 << 20), int(0.9 * vmem_cap)))

    cost = pl.CostEstimate(
        flops=2 * L * rows * d * d,
        transcendentals=0,
        bytes_accessed=2 * rows * F * a_item + L * d * d * w_item,
    )

    # Weight BlockSpec: constant block index -> fetched once per core.
    if single_buffer_weights:
        w_spec = pl.BlockSpec((L, d, d), lambda i: (0, 0, 0),
                              pipeline_mode=pl.Buffered(1))
    else:
        w_spec = pl.BlockSpec((L, d, d), lambda i: (0, 0, 0))

    out2d = pl.pallas_call(
        rev_mlp_kernel,
        out_shape=jax.ShapeDtypeStruct((rows, F), x.dtype),
        grid_spec=pltpu.PrefetchScalarGridSpec(
            num_scalar_prefetch=0,
            grid=grid,
            in_specs=[
                # Full-width (F) activation tile: fuses split/concat, lane-dense I/O.
                pl.BlockSpec((tile_r, F), lambda i: (i, 0)),
                w_spec,
            ],
            out_specs=pl.BlockSpec((tile_r, F), lambda i: (i, 0)),
        ),
        compiler_params=pltpu.CompilerParams(
            dimension_semantics=("parallel",),   # megacore sharding on v7x
            vmem_limit_bytes=vmem_limit,
        ),
        cost_estimate=cost,
    )(x2d, w_prepared)

    return out2d.reshape(B, C, F)


# ---------------------------------------------------------------------------
# Pure-JAX reference (for correctness check); weights in nn.Linear (out, in) layout.
# ---------------------------------------------------------------------------
def reversible_mlp_reference(x, weights):
    d = x.shape[-1] // 2
    x1, x2 = x[..., :d], x[..., d:]
    for l in range(weights.shape[0]):
        h = jnp.einsum("...i,oi->...o", x2, weights[l])   # nn.Linear: x @ W^T
        x1, x2 = x2, x1 + h
    return jnp.concatenate([x1, x2], axis=-1)


if __name__ == "__main__":
    # Small shapes consistent with the module: feature_dim=256 (d=128 lane-dense halves),
    # num_layers=4, input (batch=2, channels=8, feature_dim=256).
    B, C, feature_dim, num_layers = 2, 8, 256, 4
    d = feature_dim // 2

    key = jax.random.PRNGKey(0)
    k_x, k_w, k_xr, k_wr = jax.random.split(key, 4)
    x = jax.random.normal(k_x, (B, C, feature_dim), dtype=jnp.float32)
    # Deterministic per-layer nn.Linear weights (out=d, in=d), bias=False.
    weights = 0.1 * jax.random.normal(k_w, (num_layers, d, d), dtype=jnp.float32)
    ref = reversible_mlp_reference(x, weights)

    # --- f32 path (tight tolerance) ---------------------------------------
    w_prep = prepare_reversible_mlp_weights(weights)   # transpose hoisted out of fwd
    out = jax.block_until_ready(reversible_mlp_forward(x, w_prep))
    assert out.shape == (B, C, feature_dim)
    assert jnp.allclose(out, ref, rtol=1e-5, atol=1e-5), "f32 mismatch vs reference"

    # --- ragged row count (exercises masked last tile; no wrapper pad/slice) ---
    Br, Cr, Lr = 3, 5, 3   # rows = 15, not a multiple of the row tile
    xr = jax.random.normal(k_xr, (Br, Cr, feature_dim), dtype=jnp.float32)
    wr = 0.1 * jax.random.normal(k_wr, (Lr, d, d), dtype=jnp.float32)
    outr = jax.block_until_ready(
        reversible_mlp_forward(xr, prepare_reversible_mlp_weights(wr)))
    refr = reversible_mlp_reference(xr, wr)
    assert jnp.allclose(outr, refr, rtol=1e-5, atol=1e-5), "ragged mismatch vs reference"

    # --- bf16 compute + bf16 activation I/O (looser tolerance) -------------
    w_bf16 = prepare_reversible_mlp_weights(weights, compute_dtype=jnp.bfloat16)
    out_bf = jax.block_until_ready(
        reversible_mlp_forward(x.astype(jnp.bfloat16), w_bf16))
    assert out_bf.dtype == jnp.bfloat16
    assert jnp.allclose(out_bf.astype(jnp.float32), ref, rtol=5e-2, atol=1.5e-1), \
        "bf16 mismatch vs reference"

    print("KERNEL_OK")
</pallas_src>

<mosaic_0001>
module attributes {stable_mosaic.version = 11 : i64} {
  func.func @rev_mlp_kernel(%arg0: i32, %arg1: memref<16x256xf32, #tpu.memory_space<vmem>>, %arg2: memref<4x128x128xf32, #tpu.memory_space<vmem>>, %arg3: memref<16x256xf32, #tpu.memory_space<vmem>>) attributes {dimension_semantics = [#tpu.dimension_semantics<parallel>], iteration_bounds = array<i64: 1>, scalar_prefetch = 0 : i64, scratch_operands = 0 : i64, tpu.core_type = #tpu.core_type<tc>, window_params = [{transform_indices = @transform_0, window_bounds = array<i64: 16, 256>}, {pipeline_mode = #tpu.pipeline_mode<synchronous>, transform_indices = @transform_1, window_bounds = array<i64: 4, 128, 128>}, {transform_indices = @transform_2, window_bounds = array<i64: 16, 256>}]} {
    %c0 = arith.constant 0 : index
    %c0_0 = arith.constant 0 : index
    %0 = vector.load %arg1[%c0, %c0_0] : memref<16x256xf32, #tpu.memory_space<vmem>>, vector<16x256xf32>
    %1 = vector.extract_strided_slice %0 {offsets = [0, 0], sizes = [16, 128], strides = [1, 1]} : vector<16x256xf32> to vector<16x128xf32>
    %2 = vector.extract_strided_slice %0 {offsets = [0, 128], sizes = [16, 128], strides = [1, 1]} : vector<16x256xf32> to vector<16x128xf32>
    %c0_1 = arith.constant 0 : index
    %c0_2 = arith.constant 0 : index
    %c0_3 = arith.constant 0 : index
    %3 = vector.load %arg2[%c0_1, %c0_2, %c0_3] : memref<4x128x128xf32, #tpu.memory_space<vmem>>, vector<1x128x128xf32>
    %4 = vector.shape_cast %3 : vector<1x128x128xf32> to vector<128x128xf32>
    %cst = arith.constant dense<0.000000e+00> : vector<16x128xf32>
    %5 = tpu.matmul %2, %4, %cst {dimension_numbers = #tpu.dot_dimension_numbers<[1], [0], [0], [1], [0, 0, 1, 1], [], []>} : vector<16x128xf32>, vector<128x128xf32>, vector<16x128xf32> -> vector<16x128xf32>
    %6 = arith.addf %1, %5 : vector<16x128xf32>
    %c1 = arith.constant 1 : index
    %c0_4 = arith.constant 0 : index
    %c0_5 = arith.constant 0 : index
    %7 = vector.load %arg2[%c1, %c0_4, %c0_5] : memref<4x128x128xf32, #tpu.memory_space<vmem>>, vector<1x128x128xf32>
    %8 = vector.shape_cast %7 : vector<1x128x128xf32> to vector<128x128xf32>
    %cst_6 = arith.constant dense<0.000000e+00> : vector<16x128xf32>
    %9 = tpu.matmul %6, %8, %cst_6 {dimension_numbers = #tpu.dot_dimension_numbers<[1], [0], [0], [1], [0, 0, 1, 1], [], []>} : vector<16x128xf32>, vector<128x128xf32>, vector<16x128xf32> -> vector<16x128xf32>
    %10 = arith.addf %2, %9 : vector<16x128xf32>
    %c2 = arith.constant 2 : index
    %c0_7 = arith.constant 0 : index
    %c0_8 = arith.constant 0 : index
    %11 = vector.load %arg2[%c2, %c0_7, %c0_8] : memref<4x128x128xf32, #tpu.memory_space<vmem>>, vector<1x128x128xf32>
    %12 = vector.shape_cast %11 : vector<1x128x128xf32> to vector<128x128xf32>
    %cst_9 = arith.constant dense<0.000000e+00> : vector<16x128xf32>
    %13 = tpu.matmul %10, %12, %cst_9 {dimension_numbers = #tpu.dot_dimension_numbers<[1], [0], [0], [1], [0, 0, 1, 1], [], []>} : vector<16x128xf32>, vector<128x128xf32>, vector<16x128xf32> -> vector<16x128xf32>
    %14 = arith.addf %6, %13 : vector<16x128xf32>
    %c3 = arith.constant 3 : index
    %c0_10 = arith.constant 0 : index
    %c0_11 = arith.constant 0 : index
    %15 = vector.load %arg2[%c3, %c0_10, %c0_11] : memref<4x128x128xf32, #tpu.memory_space<vmem>>, vector<1x128x128xf32>
    %16 = vector.shape_cast %15 : vector<1x128x128xf32> to vector<128x128xf32>
    %cst_12 = arith.constant dense<0.000000e+00> : vector<16x128xf32>
    %17 = tpu.matmul %14, %16, %cst_12 {dimension_numbers = #tpu.dot_dimension_numbers<[1], [0], [0], [1], [0, 0, 1, 1], [], []>} : vector<16x128xf32>, vector<128x128xf32>, vector<16x128xf32> -> vector<16x128xf32>
    %18 = arith.addf %10, %17 : vector<16x128xf32>
    %c0_13 = arith.constant 0 : index
    %c0_14 = arith.constant 0 : index
    %19 = vector.load %arg3[%c0_13, %c0_14] : memref<16x256xf32, #tpu.memory_space<vmem>>, vector<16x128xf32>
    tpu.vector_store %arg3[%c0_13, %c0_14], %14 {strides = array<i32>} : memref<16x256xf32, #tpu.memory_space<vmem>>, vector<16x128xf32>,
    %c0_15 = arith.constant 0 : index
    %c128 = arith.constant 128 : index
    %20 = vector.load %arg3[%c0_15, %c128] : memref<16x256xf32, #tpu.memory_space<vmem>>, vector<16x128xf32>
    tpu.vector_store %arg3[%c0_15, %c128], %18 {strides = array<i32>} : memref<16x256xf32, #tpu.memory_space<vmem>>, vector<16x128xf32>,
    return
  }
  func.func @transform_0(%arg0: i32) -> (i32, i32) {
    %c0_i32 = arith.constant 0 : i32
    %c0_i32_0 = arith.constant 0 : i32
    return %arg0, %c0_i32 : i32, i32
  }
  func.func @transform_1(%arg0: i32) -> (i32, i32, i32) {
    %c0_i32 = arith.constant 0 : i32
    %c0_i32_0 = arith.constant 0 : i32
    %c0_i32_1 = arith.constant 0 : i32
    %c0_i32_2 = arith.constant 0 : i32
    return %c0_i32, %c0_i32_0, %c0_i32_1 : i32, i32, i32
  }
  func.func @transform_2(%arg0: i32) -> (i32, i32) {
    %c0_i32 = arith.constant 0 : i32
    %c0_i32_0 = arith.constant 0 : i32
    return %arg0, %c0_i32 : i32, i32
  }
}

</mosaic_0001>

<bundles_post_ra>
// kernel: tpu_custom_call.1
= control target key start
LH: loop header
LB: loop body
LE: loop exit
PB: predicated region body
PF: predicated region fallthrough
CT: control target
= control target key end

     0   :  { %7 = vsyncpa [#allocation3], 0  ;;  %s932_s0 = inlined_call_operand.hbm [shape: f32[16,256], index: 0, kind: input, shape index: {}]   ;;  %s933_s1 = inlined_call_operand.hbm [shape: f32[4,128,128], index: 1, kind: input, shape index: {}]   ;;  %s934_s2 = inlined_call_operand.hbm [shape: f32[16,256], index: 2, kind: output, shape index: {}]  }
   0x1   :  { %8 = vsyncpa [#allocation6], 0 }
   0x2   :  { %9 = vsyncpa [#allocation4], 0  ;;  %s860_s9 = smov [#allocation2]   ;;  %s788_s13 = scalar_lea.hbm %s932_s0, 512 }
   0x3   :  { %s15_s10 = sshll.u32 %s860_s9, 4  ;;  %p789_p0 = scmp.ne.s32.totalorder %s932_s0, %s788_s13  ;;  %s16_s10 = int_to_ptr.vmem [resolvable:$true] %s15_s10 }
   0x4   :  { %p792_p1 = scmp.lt.u32.totalorder %s788_s13, %s932_s0 }
   0x6   :  { %p794_p2 = pnand %p792_p1, %p789_p0 }
   0x8   :  { %797 = shalt.err (!%p794_p2)
}
   0x9   :  { %s798_s18 = scalar_lea.vmem %s16_s10, 512  ;;  %p803_p4 = scmp.lt.s32.totalorder %s16_s10, %s16_s10 }
   0xa   :  { %p799_p3 = scmp.ne.s32.totalorder %s16_s10, %s798_s18  ;;  %p804_p5 = scmp.lt.s32.totalorder %s798_s18, %s798_s18 }
   0xc   :  { %p805_p6 = por %p804_p5, %p803_p4 }
   0xe   :  { %p806_p7 = pnand %p805_p6, %p799_p3 }
  0x10   :  { %809 = shalt.err (!%p806_p7)
}
  0x11   :  { %s861_s19 = smov 256   ;;  %s862_s20 = smov 16  }
  0x12   :  { %21 = dma.hbm_to_vmem [thread:$0]  %s932_s0, 512, %s16_s10, [#allocation3], %s861_s19, %s861_s19, %s862_s20  }
  0x13   :  { %s863_s23 = smov [#allocation5]   ;;  %s810_s27 = scalar_lea.hbm %s933_s1, 8192 }
  0x14   :  { %s27_s24 = sshll.u32 %s863_s23, 4  ;;  %p811_p8 = scmp.ne.s32.totalorder %s933_s1, %s810_s27  ;;  %s28_s24 = int_to_ptr.vmem [resolvable:$true] %s27_s24 }
  0x15   :  { %p814_p9 = scmp.lt.u32.totalorder %s810_s27, %s933_s1 }
  0x17   :  { %p816_p10 = pnand %p814_p9, %p811_p8 }
  0x19   :  { %819 = shalt.err (!%p816_p10)
}
  0x1a   :  { %s820_s4 = scalar_lea.vmem %s28_s24, 8192  ;;  %p825_p12 = scmp.lt.s32.totalorder %s28_s24, %s28_s24 }
  0x1b   :  { %p821_p11 = scmp.ne.s32.totalorder %s28_s24, %s820_s4  ;;  %p826_p13 = scmp.lt.s32.totalorder %s820_s4, %s820_s4 }
  0x1d   :  { %p827_p0 = por %p826_p13, %p825_p12 }
  0x1f   :  { %p828_p1 = pnand %p827_p0, %p821_p11 }
  0x21   :  { %831 = shalt.err (!%p828_p1)
}
  0x22   :  { %s864_s0 = smov 128   ;;  %s865_s5 = smov 8  }
  0x23   :  { %33 = dma.hbm_to_vmem [thread:$0]  %s933_s1, 8192, %s28_s24, [#allocation6], %s864_s0, %s864_s0, %s865_s5  }
  0x24   :  { %854 = dma.done.wait [#allocation3], 512  }
  0x25   :  { %855 = vsyncadd [#allocation3], 4294966784 }
  0x26   :  { %856 = dma.done.wait [#allocation6], 8192  }
  0x27   :  { %857 = vsyncadd [#allocation6], 4294959104  ;;  %v44_v0 = vld [vmem:[#allocation5] sm:$0xff]  ;;  %v45_v1 = vld [vmem:[#allocation5 + $0x8] sm:$0xff]  ;;  %s866_s1 = smov [#allocation7]  }
  0x28   :  { %v46_v2 = vld [vmem:[#allocation5 + $0x10] sm:$0xff]  ;;  %v653_v3 = vpack.c.bf16 %v45_v1, %v44_v0  ;;  %v47_v4 = vld [vmem:[#allocation5 + $0x18] sm:$0xff]  ;;  %v48_v6 = vld [vmem:[#allocation5 + $0x20] sm:$0xff]  ;;  %s428_s8 = sshll.u32 %s866_s1, 4  ;;  %s429_s8 = int_to_ptr.vmem [resolvable:$true] %s428_s8 }
  0x29   :  { %v657_v5 = vpack.c.bf16 %v47_v4, %v46_v2  ;;  %v49_v7 = vld [vmem:[#allocation5 + $0x28] sm:$0xff]  ;;  %v50_v9 = vld [vmem:[#allocation5 + $0x30] sm:$0xff]  ;;  %v51_v10 = vld [vmem:[#allocation5 + $0x38] sm:$0xff]  ;;  %s832_s9 = scalar_lea.vmem %s429_s8, 512  ;;  %p837_p3 = scmp.lt.s32.totalorder %s429_s8, %s429_s8 }
  0x2a   :  { %654 = vmatprep.subr.bf16.mxu0 %v653_v3  ;;  %v661_v8 = vpack.c.bf16 %v49_v7, %v48_v6  ;;  %v909_v11 = vld [vmem:[#allocation2 + $0x8] sm:$0xff]  ;;  %v138_v12 = vld [vmem:[#allocation5 + $0x80] sm:$0xff]  ;;  %v140_v14 = vld [vmem:[#allocation5 + $0x90] sm:$0xff]  ;;  %v665_v20 = vpack.c.bf16 %v51_v10, %v50_v9  ;;  %p833_p2 = scmp.ne.s32.totalorder %s429_s8, %s832_s9  ;;  %p838_p4 = scmp.lt.s32.totalorder %s832_s9, %s832_s9 }
  0x2b   :  { %656 = vmatpush3.bf16.msra.mxu0 %v653_v3  ;;  %545 = vmatprep.mubr.f32.mxu0 %v909_v11  ;;  %v139_v13 = vld [vmem:[#allocation5 + $0x88] sm:$0xff]  ;;  %v141_v16 = vld [vmem:[#allocation5 + $0x98] sm:$0xff]  ;;  %v142_v18 = vld [vmem:[#allocation5 + $0xa0] sm:$0xff] }
  0x2c   :  { %658 = vmatprep.subr.bf16.mxu0 %v657_v5  ;;  %v685_v15 = vpack.c.bf16 %v139_v13, %v138_v12  ;;  %v689_v17 = vpack.c.bf16 %v141_v16, %v140_v14  ;;  %v143_v19 = vld [vmem:[#allocation5 + $0xa8] sm:$0xff]  ;;  %v52_v21 = vld [vmem:[#allocation5 + $0x40] sm:$0xff]  ;;  %v144_v24 = vld [vmem:[#allocation5 + $0xb0] sm:$0xff]  ;;  %p839_p5 = por %p838_p4, %p837_p3 }
  0x2d   :  { %v53_v22 = vld [vmem:[#allocation5 + $0x48] sm:$0xff]  ;;  %v693_v23 = vpack.c.bf16 %v143_v19, %v142_v18  ;;  %v145_v25 = vld [vmem:[#allocation5 + $0xb8] sm:$0xff]  ;;  %v54_v27 = vld [vmem:[#allocation5 + $0x50] sm:$0xff] }
  0x2e   :  { %686 = vmatprep.subr.bf16.mxu1 %v685_v15  ;;  %v669_v26 = vpack.c.bf16 %v53_v22, %v52_v21  ;;  %v55_v28 = vld [vmem:[#allocation5 + $0x58] sm:$0xff]  ;;  %v697_v29 = vpack.c.bf16 %v145_v25, %v144_v24  ;;  %v146_v30 = vld [vmem:[#allocation5 + $0xc0] sm:$0xff]  ;;  %v147_v31 = vld [vmem:[#allocation5 + $0xc8] sm:$0xff]  ;;  %p840_p6 = pnand %p839_p5, %p833_p2 }
  0x2f   :  { %660 = vmatpush3.bf16.msra.mxu0 %v657_v5  ;;  %688 = vmatpush3.bf16.msra.mxu1 %v685_v15  ;;  %v673_v32 = vpack.c.bf16 %v55_v28, %v54_v27  ;;  %v56_v33 = vld [vmem:[#allocation5 + $0x60] sm:$0xff]  ;;  %v57_v34 = vld [vmem:[#allocation5 + $0x68] sm:$0xff]  ;;  %v701_v35 = vpack.c.bf16 %v147_v31, %v146_v30  ;;  %v148_v36 = vld [vmem:[#allocation5 + $0xd0] sm:$0xff] }
  0x30   :  { %662 = vmatprep.subr.bf16.mxu0 %v661_v8  ;;  %690 = vmatprep.subr.bf16.mxu1 %v689_v17  ;;  %v149_v37 = vld [vmem:[#allocation5 + $0xd8] sm:$0xff]  ;;  %v677_v38 = vpack.c.bf16 %v57_v34, %v56_v33  ;;  %v58_v39 = vld [vmem:[#allocation5 + $0x70] sm:$0xff]  ;;  %v150_v42 = vld [vmem:[#allocation5 + $0xe0] sm:$0xff] }
  0x31   :  { %v59_v40 = vld [vmem:[#allocation5 + $0x78] sm:$0xff]  ;;  %v705_v41 = vpack.c.bf16 %v149_v37, %v148_v36  ;;  %v151_v43 = vld [vmem:[#allocation5 + $0xe8] sm:$0xff]  ;;  %v152_v47 = vld [vmem:[#allocation5 + $0xf0] sm:$0xff] }
  0x32   :  { %v681_v44 = vpack.c.bf16 %v59_v40, %v58_v39  ;;  %v709_v45 = vpack.c.bf16 %v151_v43, %v150_v42  ;;  %v912_v46 = vld [vmem:[#allocation2 + $0x18] sm:$0xff]  ;;  %v232_v50 = vld [vmem:[#allocation5 + $0x100] sm:$0xff]  ;;  %v233_v51 = vld [vmem:[#allocation5 + $0x108] sm:$0xff] }
  0x33   :  { %664 = vmatpush3.bf16.msra.mxu0 %v661_v8  ;;  %692 = vmatpush3.bf16.msra.mxu1 %v689_v17  ;;  %v153_v48 = vld [vmem:[#allocation5 + $0xf8] sm:$0xff]  ;;  %v234_v52 = vld [vmem:[#allocation5 + $0x110] sm:$0xff]  ;;  %v717_v53 = vpack.c.bf16 %v233_v51, %v232_v50  ;;  %v236_v56 = vld [vmem:[#allocation5 + $0x120] sm:$0xff] }
  0x34   :  { %666 = vmatprep.subr.bf16.mxu0 %v665_v20  ;;  %694 = vmatprep.subr.bf16.mxu1 %v693_v23  ;;  %v713_v49 = vpack.c.bf16 %v153_v48, %v152_v47  ;;  %v235_v54 = vld [vmem:[#allocation5 + $0x118] sm:$0xff]  ;;  %v237_v57 = vld [vmem:[#allocation5 + $0x128] sm:$0xff]  ;;  %v238_v59 = vld [vmem:[#allocation5 + $0x130] sm:$0xff] }
  0x35   :  { %v721_v55 = vpack.c.bf16 %v235_v54, %v234_v52  ;;  %v725_v58 = vpack.c.bf16 %v237_v57, %v236_v56  ;;  %v239_v60 = vld [vmem:[#allocation5 + $0x138] sm:$0xff]  ;;  %v240_v62 = vld [vmem:[#allocation5 + $0x140] sm:$0xff]  ;;  %v241_v63 = vld [vmem:[#allocation5 + $0x148] sm:$0xff] }
  0x36   :  { %v729_v61 = vpack.c.bf16 %v239_v60, %v238_v59  ;;  %v733_v0 = vpack.c.bf16 %v241_v63, %v240_v62  ;;  %v242_v1 = vld [vmem:[#allocation5 + $0x150] sm:$0xff]  ;;  %v243_v2 = vld [vmem:[#allocation5 + $0x158] sm:$0xff]  ;;  %v244_v4 = vld [vmem:[#allocation5 + $0x160] sm:$0xff] }
  0x37   :  { %668 = vmatpush3.bf16.msra.mxu0 %v665_v20  ;;  %696 = vmatpush3.bf16.msra.mxu1 %v693_v23  ;;  %v737_v3 = vpack.c.bf16 %v243_v2, %v242_v1  ;;  %v245_v5 = vld [vmem:[#allocation5 + $0x168] sm:$0xff]  ;;  %v40_v7 = vld [vmem:[#allocation2] sm:$0xff]  ;;  %v42_v8 = vld [vmem:[#allocation2 + $0x10] sm:$0xff] }
  0x38   :  { %670 = vmatprep.subr.bf16.mxu0 %v669_v26  ;;  %698 = vmatprep.subr.bf16.mxu1 %v697_v29  ;;  %v741_v6 = vpack.c.bf16 %v245_v5, %v244_v4  ;;  %v246_v14 = vld [vmem:[#allocation5 + $0x170] sm:$0xff]  ;;  %v247_v15 = vld [vmem:[#allocation5 + $0x178] sm:$0xff]  ;;  %v326_v17 = vld [vmem:[#allocation5 + $0x180] sm:$0xff] }
  0x39   :  { %v745_v16 = vpack.c.bf16 %v247_v15, %v246_v14  ;;  %v327_v18 = vld [vmem:[#allocation5 + $0x188] sm:$0xff]  ;;  %v328_v19 = vld [vmem:[#allocation5 + $0x190] sm:$0xff]  ;;  %v329_v21 = vld [vmem:[#allocation5 + $0x198] sm:$0xff] }
  0x3a   :  { %v749_v20 = vpack.c.bf16 %v327_v18, %v326_v17  ;;  %v753_v22 = vpack.c.bf16 %v329_v21, %v328_v19  ;;  %v330_v23 = vld [vmem:[#allocation5 + $0x1a0] sm:$0xff]  ;;  %v331_v24 = vld [vmem:[#allocation5 + $0x1a8] sm:$0xff]  ;;  %v333_v27 = vld [vmem:[#allocation5 + $0x1b8] sm:$0xff] }
  0x3b   :  { %672 = vmatpush3.bf16.msra.mxu0 %v669_v26  ;;  %700 = vmatpush3.bf16.msra.mxu1 %v697_v29  ;;  %v757_v25 = vpack.c.bf16 %v331_v24, %v330_v23  ;;  %v332_v26 = vld [vmem:[#allocation5 + $0x1b0] sm:$0xff]  ;;  %v334_v29 = vld [vmem:[#allocation5 + $0x1c0] sm:$0xff]  ;;  %v335_v30 = vld [vmem:[#allocation5 + $0x1c8] sm:$0xff] }
  0x3c   :  { %674 = vmatprep.subr.bf16.mxu0 %v673_v32  ;;  %702 = vmatprep.subr.bf16.mxu1 %v701_v35  ;;  %v761_v28 = vpack.c.bf16 %v333_v27, %v332_v26  ;;  %v765_v31 = vpack.c.bf16 %v335_v30, %v334_v29  ;;  %v337_v33 = vld [vmem:[#allocation5 + $0x1d8] sm:$0xff]  ;;  %v339_v36 = vld [vmem:[#allocation5 + $0x1e8] sm:$0xff]  ;;  %v340_v42 = vld [vmem:[#allocation5 + $0x1f0] sm:$0xff] }
  0x3d   :  { %v341_v43 = vld [vmem:[#allocation5 + $0x1f8] sm:$0xff] }
  0x3f   :  { %676 = vmatpush3.bf16.msra.mxu0 %v673_v32  ;;  %704 = vmatpush3.bf16.msra.mxu1 %v701_v35  ;;  %v336_v32 = vld [vmem:[#allocation5 + $0x1d0] sm:$0xff]  ;;  %v338_v35 = vld [vmem:[#allocation5 + $0x1e0] sm:$0xff] }
  0x40   :  { %678 = vmatprep.subr.bf16.mxu0 %v677_v38  ;;  %706 = vmatprep.subr.bf16.mxu1 %v705_v41  ;;  %v769_v34 = vpack.c.bf16 %v337_v33, %v336_v32  ;;  %v773_v37 = vpack.c.bf16 %v339_v36, %v338_v35 }
  0x43   :  { %680 = vmatpush3.bf16.msra.mxu0 %v677_v38  ;;  %708 = vmatpush3.bf16.msra.mxu1 %v705_v41 }
  0x44   :  { %682 = vmatprep.subr.bf16.mxu0 %v681_v44  ;;  %710 = vmatprep.subr.bf16.mxu1 %v709_v45 }
  0x47   :  { %684 = vmatpush3.bf16.msra.mxu0 %v681_v44  ;;  %712 = vmatpush3.bf16.msra.mxu1 %v709_v45  ;;  %v777_v44 = vpack.c.bf16 %v341_v43, %v340_v42 }
  0x48   :  { %714 = vmatprep.subr.bf16.mxu1 %v713_v49  ;;  %718 = vmatprep.subr.bf16.mxu0 %v717_v53 }
  0x4a   :  { %546 = vmatmul.mubr.f32.vlgmr.msra.gmra.mrb[0].mxu0 %v912_v46 }
  0x4b   :  { %716 = vmatpush3.bf16.msra.mxu1 %v713_v49  ;;  %720 = vmatpush3.bf16.msra.mxu0 %v717_v53 }
  0x4c   :  { %722 = vmatprep.subr.bf16.mxu0 %v721_v55  ;;  %750 = vmatprep.subr.bf16.mxu1 %v749_v20 }
  0x4f   :  { %724 = vmatpush3.bf16.msra.mxu0 %v721_v55 }
  0x50   :  { %726 = vmatprep.subr.bf16.mxu0 %v725_v58 }
  0x53   :  { %728 = vmatpush3.bf16.msra.mxu0 %v725_v58 }
  0x54   :  { %730 = vmatprep.subr.bf16.mxu0 %v729_v61 }
  0x57   :  { %732 = vmatpush3.bf16.msra.mxu0 %v729_v61 }
  0x58   :  { %734 = vmatprep.subr.bf16.mxu0 %v733_v0 }
  0x5b   :  { %736 = vmatpush3.bf16.msra.mxu0 %v733_v0 }
  0x5c   :  { %738 = vmatprep.subr.bf16.mxu0 %v737_v3 }
  0x5f   :  { %740 = vmatpush3.bf16.msra.mxu0 %v737_v3 }
  0x60   :  { %742 = vmatprep.subr.bf16.mxu0 %v741_v6 }
  0x63   :  { %744 = vmatpush3.bf16.msra.mxu0 %v741_v6 }
  0x64   :  { %746 = vmatprep.subr.bf16.mxu0 %v745_v16 }
  0x67   :  { %748 = vmatpush3.bf16.msra.mxu0 %v745_v16 }
 0x11d   :  { %v547_v9 = vpop.f32.mrb[0].mxu0 }
 0x11e   :  { %v126_v10 = vpop.f32.mrb[1].mxu0  ;;  %v136_v13 = vadd.f32 %v547_v9, %v42_v8 }
 0x11f   :  { %v135_v12 = vadd.f32 %v126_v10, %v40_v7 }
 0x121   :  { %580 = vmatprep.mubr.f32.mxu1 %v135_v12 }
 0x122   :  { %581 = vmatmul.mubr.f32.vlgmr.msra.gmra.mrb[0].mxu1 %v136_v13 }
 0x123   :  { %752 = vmatpush3.bf16.msra.mxu1 %v749_v20 }
 0x124   :  { %754 = vmatprep.subr.bf16.mxu1 %v753_v22 }
 0x127   :  { %756 = vmatpush3.bf16.msra.mxu1 %v753_v22 }
 0x128   :  { %758 = vmatprep.subr.bf16.mxu1 %v757_v25 }
 0x12b   :  { %760 = vmatpush3.bf16.msra.mxu1 %v757_v25 }
 0x12c   :  { %762 = vmatprep.subr.bf16.mxu1 %v761_v28 }
 0x12f   :  { %764 = vmatpush3.bf16.msra.mxu1 %v761_v28 }
 0x130   :  { %766 = vmatprep.subr.bf16.mxu1 %v765_v31 }
 0x133   :  { %768 = vmatpush3.bf16.msra.mxu1 %v765_v31 }
 0x134   :  { %770 = vmatprep.subr.bf16.mxu1 %v769_v34 }
 0x137   :  { %772 = vmatpush3.bf16.msra.mxu1 %v769_v34 }
 0x138   :  { %774 = vmatprep.subr.bf16.mxu1 %v773_v37 }
 0x13b   :  { %776 = vmatpush3.bf16.msra.mxu1 %v773_v37 }
 0x13c   :  { %778 = vmatprep.subr.bf16.mxu1 %v777_v44 }
 0x13f   :  { %780 = vmatpush3.bf16.msra.mxu1 %v777_v44 }
 0x1f5   :  { %v582_v38 = vpop.f32.mrb[0].mxu1 }
 0x1f6   :  { %v220_v39 = vpop.f32.mrb[1].mxu1  ;;  %v230_v41 = vadd.f32 %v582_v38, %v912_v46 }
 0x1f7   :  { %v229_v40 = vadd.f32 %v220_v39, %v909_v11 }
 0x1f9   :  { %615 = vmatprep.mubr.f32.mxu0 %v229_v40 }
 0x1fa   :  { %616 = vmatmul.mubr.f32.vlgmr.msra.gmra.mrb[2].mxu0 %v230_v41 }
 0x2cd   :  { %v617_v45 = vpop.f32.mrb[2].mxu0 }
 0x2ce   :  { %v324_v47 = vadd.f32 %v617_v45, %v136_v13  ;;  %v314_v48 = vpop.f32.mrb[3].mxu0 }
 0x2cf   :  { %v323_v49 = vadd.f32 %v314_v48, %v135_v12 }
 0x2d0   :  { %420 = vst [vmem:[#allocation7 + $0x10] sm:$0xff] %v324_v47 }
 0x2d1   :  { %419 = vst [vmem:[#allocation7] sm:$0xff] %v323_v49  ;;  %650 = vmatprep.mubr.f32.mxu1 %v323_v49 }
 0x2d2   :  { %651 = vmatmul.mubr.f32.vlgmr.msra.gmra.mrb[2].mxu1 %v324_v47 }
 0x3a5   :  { %v652_v11 = vpop.f32.mrb[2].mxu1 }
 0x3a6   :  { %v418_v50 = vadd.f32 %v652_v11, %v230_v41  ;;  %v408_v46 = vpop.f32.mrb[3].mxu1 }
 0x3a7   :  { %v417_v51 = vadd.f32 %v408_v46, %v229_v40 }
 0x3a8   :  { %422 = vst [vmem:[#allocation7 + $0x18] sm:$0xff] %v418_v50 }
 0x3a9   :  { %421 = vst [vmem:[#allocation7 + $0x8] sm:$0xff] %v417_v51 }
 0x3aa   :  { %843 = shalt.err (!%p840_p6)
}
 0x3ab   :  { %s844_s12 = scalar_lea.hbm %s934_s2, 512 }
 0x3ac   :  { %p845_p7 = scmp.ne.s32.totalorder %s934_s2, %s844_s12  ;;  %p848_p8 = scmp.lt.u32.totalorder %s844_s12, %s934_s2 }
 0x3ae   :  { %p850_p9 = pnand %p848_p8, %p845_p7 }
 0x3b0   :  { %853 = shalt.err (!%p850_p9)
}
 0x3b1   :  { %434 = dma.vmem_to_hbm [thread:$0]  %s429_s8, 512, %s934_s2, [#allocation4], %s861_s19, %s861_s19, %s862_s20  }
 0x3b2   :  { %858 = dma.done.wait [#allocation4], 512  }
 0x3b3   :  { %859 = vsyncadd [#allocation4], 4294966784 }
 0x3b4   :  { %438 = vsyncpa [#allocation3], 1 }
 0x3b5   :  { %439 = vsyncpa [#allocation6], 1 }
 0x3b6   :  { %440 = vsyncpa [#allocation4], 1 }

</bundles_post_ra>
